<compile_context>
chip_gen: v7x
topology: tpu7x:2x2x1
jax: 0.10.0
libtpu: 0.0.40
codegen_flags: <defaults>
</compile_context>

<pallas_src>
import jax
import jax.numpy as jnp
from jax.experimental import pallas as pl
from jax.experimental.pallas import tpu as pltpu


_CHUNK = 512  # lane granularity: multiple of 256 (v6e/v7x MXU) and 128 (v5e)


def _round_up(n: int, m: int) -> int:
    return ((n + m - 1) // m) * m


def _default_compute_dtype():
    """bf16 hidden path on v6e / v7x (bf16 VPU/EUP); f32 on v5e and older."""
    try:
        kind = jax.devices()[0].device_kind.lower()
    except Exception:
        return jnp.float32
    if any(tag in kind for tag in ("v6", "v7", "tpu7")):
        return jnp.bfloat16
    return jnp.float32


def _pick_batch_tile(batch: int, batch_tile: int) -> int:
    """Batch tile: multiple of 512, big by default, but keep >= 2 grid steps
    when the batch allows it (v7x has 2 TensorCores to shard 'parallel' over)."""
    tb = max(_CHUNK, _round_up(min(batch_tile, batch), _CHUNK))
    if batch > _CHUNK and pl.cdiv(batch, tb) < 2:
        tb = _round_up(pl.cdiv(batch, 2), _CHUNK)
    return tb


def critic_kernel(xt_ref, w1_ref, b1_ref, w2_ref, b2_ref, w3c_ref, b3_ref, out_ref):
    """One (features, batch-tile) grid step.

    xt_ref : (S,  TB)   states, batch on lanes          (compute dtype)
    w1_ref : (16, S)    b1_ref: (16, 1)                  (compute dtype)
    w2_ref : (16, 16)   b2_ref: (16, 1)                  (compute dtype)
    w3c_ref: (16, 1)    b3_ref: (1, 1)                   (f32)
    out_ref: (1,  TB)                                    (f32)
    """
    h = w1_ref.shape[0]
    tb = out_ref.shape[1]
    cdt = xt_ref.dtype

    w1 = w1_ref[...]
    w2 = w2_ref[...]
    # Hoist the lane-broadcasts of biases / layer-3 column out of the chunk
    # loop (JAX does not CSE broadcast_in_dim inside loops).
    b1 = jnp.broadcast_to(b1_ref[...], (h, _CHUNK))
    b2 = jnp.broadcast_to(b2_ref[...], (h, _CHUNK))
    w3 = jnp.broadcast_to(w3c_ref[...], (h, _CHUNK))   # f32
    b3 = b3_ref[...]                                    # (1, 1) f32

    def chunk(c, carry):
        off = pl.multiple_of(c * _CHUNK, _CHUNK)
        xt = xt_ref[:, pl.ds(off, _CHUNK)]                                # (S, C)
        h1 = jnp.tanh(jnp.dot(w1, xt, preferred_element_type=cdt) + b1)   # (H, C)
        h2 = jnp.tanh(jnp.dot(w2, h1, preferred_element_type=cdt) + b2)   # (H, C)
        # out_features == 1: VPU multiply + sublane (XLU) reduce in f32
        # instead of an N=1 MXU matmul.
        out = jnp.sum(w3 * h2.astype(jnp.float32), axis=0, keepdims=True) + b3
        out_ref[:, pl.ds(off, _CHUNK)] = out.astype(out_ref.dtype)
        return carry

    jax.lax.fori_loop(0, tb // _CHUNK, chunk, 0, unroll=True)


def critic_forward(x, params, *, batch_tile=8192, compute_dtype=None,
                   x_is_transposed=False):
    """Critic forward pass.

    x: (B, state_size) f32, or (state_size, B) if x_is_transposed=True (the
       preferred producer layout -- avoids any extra HBM pass in the wrapper).
    params: torch nn.Linear layout (out_features, in_features).
    Returns (B, 1) f32.
    """
    if compute_dtype is None:
        compute_dtype = _default_compute_dtype()

    if x_is_transposed:
        S, B = x.shape
        xt = x                       # already (S, B): zero wrapper-side traffic
    else:
        B, S = x.shape
        xt = x.T                     # transpose only -- no zero-padded copy

    H = params["w1"].shape[0]        # hidden = 16
    tb = _pick_batch_tile(B, batch_tile)
    grid = (pl.cdiv(B, tb),)         # partial edge block is masked by Pallas

    cdt = compute_dtype
    xt = xt.astype(cdt)
    w1 = params["w1"].astype(cdt)                            # (H, S)
    b1 = params["b1"].reshape(H, 1).astype(cdt)              # (H, 1)
    w2 = params["w2"].astype(cdt)                            # (H, H)
    b2 = params["b2"].reshape(H, 1).astype(cdt)              # (H, 1)
    w3c = params["w3"].reshape(1, H).T.astype(jnp.float32)   # (H, 1), f32
    b3 = params["b3"].reshape(1, 1).astype(jnp.float32)      # (1, 1), f32

    out = pl.pallas_call(
        critic_kernel,
        out_shape=jax.ShapeDtypeStruct((1, B), jnp.float32),
        grid=grid,
        in_specs=[
            pl.BlockSpec((S, tb), lambda i: (0, i)),    # only x is streamed
            pl.BlockSpec((H, S), lambda i: (0, 0)),     # weights: VMEM-resident
            pl.BlockSpec((H, 1), lambda i: (0, 0)),
            pl.BlockSpec((H, H), lambda i: (0, 0)),
            pl.BlockSpec((H, 1), lambda i: (0, 0)),
            pl.BlockSpec((H, 1), lambda i: (0, 0)),
            pl.BlockSpec((1, 1), lambda i: (0, 0)),
        ],
        out_specs=pl.BlockSpec((1, tb), lambda i: (0, i)),
        compiler_params=pltpu.CompilerParams(
            dimension_semantics=("parallel",),          # megacore sharding on v7x
        ),
    )(xt, w1, b1, w2, b2, w3c, b3)

    return out[0, :, None]                              # (B, 1)


def init_params(key, state_size, hidden=16, out_size=1):
    """Torch nn.Linear-style init; weights stored (out_features, in_features)."""
    ks = jax.random.split(key, 6)

    def lin(kw, kb, fan_in, fan_out):
        bound = 1.0 / jnp.sqrt(jnp.float32(fan_in))
        w = jax.random.uniform(kw, (fan_out, fan_in), jnp.float32, -bound, bound)
        b = jax.random.uniform(kb, (fan_out,), jnp.float32, -bound, bound)
        return w, b

    w1, b1 = lin(ks[0], ks[1], state_size, hidden)
    w2, b2 = lin(ks[2], ks[3], hidden, hidden)
    w3, b3 = lin(ks[4], ks[5], hidden, out_size)
    return {"w1": w1, "b1": b1, "w2": w2, "b2": b2, "w3": w3, "b3": b3}


def critic_reference(x, p):
    h1 = jnp.tanh(x @ p["w1"].T + p["b1"])
    h2 = jnp.tanh(h1 @ p["w2"].T + p["b2"])
    return h2 @ p["w3"].T + p["b3"]


if __name__ == "__main__":
    key = jax.random.PRNGKey(0)
    k_param, k_x1, k_x2 = jax.random.split(key, 3)

    state_size = 4
    params = init_params(k_param, state_size)

    # Small batch (like the RL inner loop).  Forced f32 -> tight check.
    # TODO(synk): at B ~ 8 the pallas_call launch dominates; in the real RL
    # loop batch many env steps per call (or route tiny batches through XLA).
    batch = 8
    x = jax.random.normal(k_x1, (batch, state_size), dtype=jnp.float32)
    out = jax.block_until_ready(
        critic_forward(x, params, compute_dtype=jnp.float32))
    ref = critic_reference(x, params)
    assert out.shape == (batch, 1)
    assert jnp.allclose(out, ref, atol=1e-5, rtol=1e-5)

    # Larger, non-tile-aligned batch: multi-step grid, multi-chunk inner loop
    # and a masked partial edge block.  Still forced f32 for a tight check.
    batch2 = 1200
    x2 = jax.random.normal(k_x2, (batch2, state_size), dtype=jnp.float32)
    out2 = jax.block_until_ready(
        critic_forward(x2, params, compute_dtype=jnp.float32))
    ref2 = critic_reference(x2, params)
    assert out2.shape == (batch2, 1)
    assert jnp.allclose(out2, ref2, atol=1e-5, rtol=1e-5)

    # Pre-transposed (S, B) producer layout -- no wrapper-side HBM pass at all.
    out2t = jax.block_until_ready(
        critic_forward(x2.T, params, compute_dtype=jnp.float32,
                       x_is_transposed=True))
    assert jnp.allclose(out2t, ref2, atol=1e-5, rtol=1e-5)

    # Auto compute dtype (bf16 hidden path on v6e/v7x, f32 on v5e): coarse
    # sanity bound only, since bf16 tanh is a deliberate precision trade.
    out2a = jax.block_until_ready(critic_forward(x2, params))
    assert out2a.shape == (batch2, 1)
    assert bool(jnp.max(jnp.abs(out2a - ref2)) < 0.3)

    print("KERNEL_OK")
</pallas_src>

<mosaic_0001>
module attributes {stable_mosaic.version = 11 : i64} {
  func.func @critic_kernel(%arg0: i32, %arg1: memref<4x512xf32, #tpu.memory_space<vmem>>, %arg2: memref<16x4xf32, #tpu.memory_space<vmem>>, %arg3: memref<16x1xf32, #tpu.memory_space<vmem>>, %arg4: memref<16x16xf32, #tpu.memory_space<vmem>>, %arg5: memref<16x1xf32, #tpu.memory_space<vmem>>, %arg6: memref<16x1xf32, #tpu.memory_space<vmem>>, %arg7: memref<1x1xf32, #tpu.memory_space<vmem>>, %arg8: memref<1x512xf32, #tpu.memory_space<vmem>>) attributes {dimension_semantics = [#tpu.dimension_semantics<parallel>], iteration_bounds = array<i64: 1>, scalar_prefetch = 0 : i64, scratch_operands = 0 : i64, tpu.core_type = #tpu.core_type<tc>, window_params = [{transform_indices = @transform_0, window_bounds = array<i64: 4, 512>}, {pipeline_mode = #tpu.pipeline_mode<synchronous>, transform_indices = @transform_1, window_bounds = array<i64: 16, 4>}, {pipeline_mode = #tpu.pipeline_mode<synchronous>, transform_indices = @transform_2, window_bounds = array<i64: 16, 1>}, {pipeline_mode = #tpu.pipeline_mode<synchronous>, transform_indices = @transform_3, window_bounds = array<i64: 16, 16>}, {pipeline_mode = #tpu.pipeline_mode<synchronous>, transform_indices = @transform_4, window_bounds = array<i64: 16, 1>}, {pipeline_mode = #tpu.pipeline_mode<synchronous>, transform_indices = @transform_5, window_bounds = array<i64: 16, 1>}, {pipeline_mode = #tpu.pipeline_mode<synchronous>, transform_indices = @transform_6, window_bounds = array<i64: 1, 1>}, {transform_indices = @transform_7, window_bounds = array<i64: 1, 512>}]} {
    %c0 = arith.constant 0 : index
    %c0_0 = arith.constant 0 : index
    %0 = vector.load %arg2[%c0, %c0_0] : memref<16x4xf32, #tpu.memory_space<vmem>>, vector<16x4xf32>
    %c0_1 = arith.constant 0 : index
    %c0_2 = arith.constant 0 : index
    %1 = vector.load %arg4[%c0_1, %c0_2] : memref<16x16xf32, #tpu.memory_space<vmem>>, vector<16x16xf32>
    %c0_3 = arith.constant 0 : index
    %c0_4 = arith.constant 0 : index
    %2 = vector.load %arg3[%c0_3, %c0_4] : memref<16x1xf32, #tpu.memory_space<vmem>>, vector<16x1xf32>
    %3 = vector.shape_cast %2 : vector<16x1xf32> to vector<16x1xf32>
    %4 = vector.broadcast %3 : vector<16x1xf32> to vector<16x512xf32>
    %c0_5 = arith.constant 0 : index
    %c0_6 = arith.constant 0 : index
    %5 = vector.load %arg5[%c0_5, %c0_6] : memref<16x1xf32, #tpu.memory_space<vmem>>, vector<16x1xf32>
    %6 = vector.shape_cast %5 : vector<16x1xf32> to vector<16x1xf32>
    %7 = vector.broadcast %6 : vector<16x1xf32> to vector<16x512xf32>
    %c0_7 = arith.constant 0 : index
    %c0_8 = arith.constant 0 : index
    %8 = vector.load %arg6[%c0_7, %c0_8] : memref<16x1xf32, #tpu.memory_space<vmem>>, vector<16x1xf32>
    %9 = vector.shape_cast %8 : vector<16x1xf32> to vector<16x1xf32>
    %10 = vector.broadcast %9 : vector<16x1xf32> to vector<16x512xf32>
    %c0_9 = arith.constant 0 : index
    %c0_10 = arith.constant 0 : index
    %11 = vector.load %arg7[%c0_9, %c0_10] : memref<1x1xf32, #tpu.memory_space<vmem>>, vector<1x1xf32>
    %c0_i32 = arith.constant 0 : i32
    %c512_i32 = arith.constant 512 : i32
    %12 = arith.muli %c0_i32, %c512_i32 : i32
    %13 = tpu.assume_multiple %12, 512 : i32
    %c0_11 = arith.constant 0 : index
    %14 = arith.index_cast %13 : i32 to index
    %15 = vector.load %arg1[%c0_11, %14] : memref<4x512xf32, #tpu.memory_space<vmem>>, vector<4x512xf32>
    %cst = arith.constant dense<0.000000e+00> : vector<16x512xf32>
    %16 = tpu.matmul %0, %15, %cst {dimension_numbers = #tpu.dot_dimension_numbers<[1], [0], [0], [1], [0, 0, 1, 1], [], []>} : vector<16x4xf32>, vector<4x512xf32>, vector<16x512xf32> -> vector<16x512xf32>
    %17 = arith.addf %16, %4 : vector<16x512xf32>
    %18 = math.tanh %17 : vector<16x512xf32>
    %cst_12 = arith.constant dense<0.000000e+00> : vector<16x512xf32>
    %19 = tpu.matmul %1, %18, %cst_12 {dimension_numbers = #tpu.dot_dimension_numbers<[1], [0], [0], [1], [0, 0, 1, 1], [], []>} : vector<16x16xf32>, vector<16x512xf32>, vector<16x512xf32> -> vector<16x512xf32>
    %20 = arith.addf %19, %7 : vector<16x512xf32>
    %21 = math.tanh %20 : vector<16x512xf32>
    %22 = arith.mulf %10, %21 : vector<16x512xf32>
    %cst_13 = arith.constant dense<0.000000e+00> : vector<512xf32>
    %23 = vector.multi_reduction <add>, %22, %cst_13 [0] : vector<16x512xf32> to vector<512xf32>
    %24 = vector.shape_cast %23 : vector<512xf32> to vector<1x512xf32>
    %25 = vector.broadcast %11 : vector<1x1xf32> to vector<1x512xf32>
    %26 = arith.addf %24, %25 : vector<1x512xf32>
    %c0_14 = arith.constant 0 : index
    %27 = arith.index_cast %13 : i32 to index
    %28 = vector.load %arg8[%c0_14, %27] : memref<1x512xf32, #tpu.memory_space<vmem>>, vector<1x512xf32>
    tpu.vector_store %arg8[%c0_14, %27], %26 {strides = array<i32>} : memref<1x512xf32, #tpu.memory_space<vmem>>, vector<1x512xf32>,
    %c1_i32 = arith.constant 1 : i32
    return
  }
  func.func @transform_0(%arg0: i32) -> (i32, i32) {
    %c0_i32 = arith.constant 0 : i32
    %c0_i32_0 = arith.constant 0 : i32
    return %c0_i32, %arg0 : i32, i32
  }
  func.func @transform_1(%arg0: i32) -> (i32, i32) {
    %c0_i32 = arith.constant 0 : i32
    %c0_i32_0 = arith.constant 0 : i32
    %c0_i32_1 = arith.constant 0 : i32
    return %c0_i32, %c0_i32_0 : i32, i32
  }
  func.func @transform_2(%arg0: i32) -> (i32, i32) {
    %c0_i32 = arith.constant 0 : i32
    %c0_i32_0 = arith.constant 0 : i32
    %c0_i32_1 = arith.constant 0 : i32
    return %c0_i32, %c0_i32_0 : i32, i32
  }
  func.func @transform_3(%arg0: i32) -> (i32, i32) {
    %c0_i32 = arith.constant 0 : i32
    %c0_i32_0 = arith.constant 0 : i32
    %c0_i32_1 = arith.constant 0 : i32
    return %c0_i32, %c0_i32_0 : i32, i32
  }
  func.func @transform_4(%arg0: i32) -> (i32, i32) {
    %c0_i32 = arith.constant 0 : i32
    %c0_i32_0 = arith.constant 0 : i32
    %c0_i32_1 = arith.constant 0 : i32
    return %c0_i32, %c0_i32_0 : i32, i32
  }
  func.func @transform_5(%arg0: i32) -> (i32, i32) {
    %c0_i32 = arith.constant 0 : i32
    %c0_i32_0 = arith.constant 0 : i32
    %c0_i32_1 = arith.constant 0 : i32
    return %c0_i32, %c0_i32_0 : i32, i32
  }
  func.func @transform_6(%arg0: i32) -> (i32, i32) {
    %c0_i32 = arith.constant 0 : i32
    %c0_i32_0 = arith.constant 0 : i32
    %c0_i32_1 = arith.constant 0 : i32
    return %c0_i32, %c0_i32_0 : i32, i32
  }
  func.func @transform_7(%arg0: i32) -> (i32, i32) {
    %c0_i32 = arith.constant 0 : i32
    %c0_i32_0 = arith.constant 0 : i32
    return %c0_i32, %arg0 : i32, i32
  }
}

</mosaic_0001>

<bundles_post_ra>
// kernel: tpu_custom_call.1
= control target key start
LH: loop header
LB: loop body
LE: loop exit
PB: predicated region body
PF: predicated region fallthrough
CT: control target
= control target key end

     0   :  { %s711_s0 = inlined_call_operand.vmem [shape: f32[4,8], index: 0, kind: input, shape index: {}]   ;;  %s712_s1 = inlined_call_operand.vmem [shape: f32[16,4], index: 1, kind: input, shape index: {}]   ;;  %s713_s2 = inlined_call_operand.vmem [shape: f32[16,1], index: 2, kind: input, shape index: {}]   ;;  %s714_s3 = inlined_call_operand.vmem [shape: f32[16,16], index: 3, kind: input, shape index: {}]   ;;  %s715_s4 = inlined_call_operand.vmem [shape: f32[16,1], index: 4, kind: input, shape index: {}]   ;;  %s716_s5 = inlined_call_operand.vmem [shape: f32[16,1], index: 5, kind: input, shape index: {}]   ;;  %s717_s6 = inlined_call_operand.<no memory space> [shape: f32[1,1], index: 6, kind: input, shape index: {}]   ;;  %s718_s7 = inlined_call_operand.hbm [shape: f32[1,8], index: 7, kind: output, shape index: {}]  }
   0x1   :  { %v12_v0 = vstv %s717_s6 }
   0x2   :  { %13 = vst [vmem:[#allocation2] sm:$0x1] %v12_v0 }
   0x3   :  { %14 = vsyncpa [#allocation4], 0  ;;  %v70_v1 = vld [vmem:[%s711_s0] sm:$0xff]  ;;  %vm83_vm0 = vcmask 1043456   ;;  %v71_v2 = vld [vmem:[%s711_s0 + $0x8] sm:$0xff]  ;;  %v604_v5 = vmov 0.0  }
   0x4   :  { %v74_v3 = vcombine.high %v70_v1, %v70_v1  ;;  %v75_v4 = vcombine.high %v71_v2, %v71_v2  ;;  %156 = vmatprep.mubr.f32.mxu0 %v604_v5  ;;  %233 = vmatprep.mubr.f32.mxu1 %v604_v5  ;;  %v29_v6 = vld [vmem:[%s712_s1] sm:$0xff]  ;;  %vm76_vm1 = vcmask 31744   ;;  %v605_v7 = vmov 0   ;;  %v30_v9 = vld [vmem:[%s712_s1 + $0x8] sm:$0xff] }
   0x5   :  { %544 = vset.pattern.permute.xlu0 %v605_v7  ;;  %545 = vset.pattern.permute.xlu1 %v605_v7  ;;  %v33_v8 = vld [vmem:[%s713_s2] sm:$0xff]  ;;  %v34_v10 = vld [vmem:[%s713_s2 + $0x8] sm:$0xff]  ;;  %vm254_vm2 = vcmask 130048  }
   0x6   :  { %520 = vmatprep.subr.msk.mxu0 %vm83_vm0, %v74_v3  ;;  %524 = vmatprep.subr.msk.mxu1 %vm83_vm0, %v75_v4  ;;  %v57_v11 = vld [vmem:[%s716_s5] sm:$0xff]  ;;  %v46_v14 = vld [vmem:[%s715_s4 + $0x8] sm:$0xff] }
   0x7   :  { %521 = vmatpush1.msk.msra.mxu0 %vm83_vm0, %v70_v1  ;;  %525 = vmatpush1.msk.msra.mxu1 %vm83_vm0, %v71_v2  ;;  %v45_v13 = vld [vmem:[%s715_s4] sm:$0xff]  ;;  %v58_v15 = vld [vmem:[%s716_s5 + $0x8] sm:$0xff] }
   0x8   :  { %522 = vmatmul.mubr.msk.f32.vlgmr.msra.gmra.mrb[0].mxu0 %vm76_vm1, %v29_v6  ;;  %526 = vmatmul.mubr.msk.f32.vlgmr.msra.gmra.mrb[0].mxu1 %vm76_vm1, %v29_v6  ;;  %v31_v46 = vld [vmem:[%s714_s3] sm:$0xff]  ;;  %v32_v47 = vld [vmem:[%s714_s3 + $0x8] sm:$0xff] }
   0x9   :  { %162 = vmatprep.mubr.f32.mxu0 %v604_v5  ;;  %239 = vmatprep.mubr.f32.mxu1 %v604_v5  ;;  %v69_v12 = vld [vmem:[#allocation2] sm:$0x1] }
   0xa   :  { %37 = vperm.xlu0 %544, %v33_v8   ;;  %49 = vperm.xlu1 %545, %v45_v13  }
   0xc   :  { %523 = vmatmul.mubr.msk.f32.gmra.mrb[2].mxu0 %vm76_vm1, %v30_v9  ;;  %527 = vmatmul.mubr.msk.f32.gmra.mrb[2].mxu1 %vm76_vm1, %v30_v9 }
   0xd   :  { %325 = vmatprep.mubr.f32.mxu0 %v604_v5  ;;  %402 = vmatprep.mubr.f32.mxu1 %v604_v5 }
   0xe   :  { %42 = vperm.xlu0 %544, %v34_v10   ;;  %54 = vperm.xlu1 %545, %v46_v14  }
  0x12   :  { %61 = vperm.xlu0 %544, %v57_v11   ;;  %66 = vperm.xlu1 %545, %v58_v15  }
  0x16   :  { %461 = vperm.xlu0 %544, %v69_v12  }
  0x89   :  { %v38_v16 = vpop.permute.xlu0 %37  ;;  %v50_v48 = vpop.permute.xlu1 %49 }
  0x8d   :  { %v43_v25 = vpop.permute.xlu0 %42  ;;  %v55_v57 = vpop.permute.xlu1 %54 }
  0x91   :  { %v62_v7 = vpop.permute.xlu0 %61  ;;  %v67_v8 = vpop.permute.xlu1 %66 }
  0xdb   :  { %v158_v17 = vpop.f32.mrb[0].mxu0  ;;  %v235_v18 = vpop.f32.mrb[0].mxu1 }
  0xdc   :  { %v159_v19 = vadd.f32 %v158_v17, %v38_v16  ;;  %v236_v20 = vadd.f32 %v235_v18, %v38_v16  ;;  %v160_v21 = vpop.f32.mrb[1].mxu0  ;;  %v237_v22 = vpop.f32.mrb[1].mxu1 }
  0xdd   :  { %v161_v23 = vadd.f32 %v160_v21, %v38_v16  ;;  %v238_v24 = vadd.f32 %v237_v22, %v38_v16  ;;  %v464_v16 = vlaneseq }
  0xde   :  { %548 = vtanh.f32 %v159_v19 }
  0xdf   :  { %550 = vtanh.f32 %v236_v20  ;;  %v164_v26 = vpop.f32.mrb[2].mxu0  ;;  %v241_v27 = vpop.f32.mrb[2].mxu1  ;;  %vm503_vm3 = vcmp.lt.s32.totalorder %v464_v16, 512 }
  0xe0   :  { %552 = vtanh.f32 %v161_v23  ;;  %v165_v28 = vadd.f32 %v164_v26, %v43_v25  ;;  %v242_v29 = vadd.f32 %v241_v27, %v43_v25  ;;  %v166_v30 = vpop.f32.mrb[3].mxu0  ;;  %v243_v31 = vpop.f32.mrb[3].mxu1  ;;  %v465_v27 = vshrl.u32 %v464_v16, 7 }
  0xe1   :  { %554 = vtanh.f32 %v238_v24  ;;  %v167_v32 = vadd.f32 %v166_v30, %v43_v25  ;;  %v244_v33 = vadd.f32 %v243_v31, %v43_v25 }
  0xe2   :  { %556 = vtanh.f32 %v165_v28 }
  0xe3   :  { %558 = vtanh.f32 %v242_v29 }
  0xe4   :  { %560 = vtanh.f32 %v167_v32 }
  0xe5   :  { %562 = vtanh.f32 %v244_v33 }
  0xe8   :  { %v549_v34 = vpop.eup %548 }
  0xe9   :  { %v551_v35 = vpop.eup %550 }
  0xea   :  { %v553_v36 = vpop.eup %552 }
  0xeb   :  { %v555_v37 = vpop.eup %554 }
  0xec   :  { %v557_v38 = vpop.eup %556 }
  0xed   :  { %v559_v39 = vpop.eup %558  ;;  %v534_v40 = vpack.c.bf16 %v557_v38, %v549_v34 }
  0xee   :  { %v561_v41 = vpop.eup %560  ;;  %v538_v42 = vpack.c.bf16 %v559_v39, %v551_v35 }
  0xef   :  { %v563_v43 = vpop.eup %562  ;;  %v532_v44 = vpack.c.bf16 %v561_v41, %v553_v36  ;;  %v466_v36 = vsub.s32 0, %v465_v27  ;;  %v462_v41 = vpop.permute.xlu0 %461 }
  0xf0   :  { %v536_v45 = vpack.c.bf16 %v563_v43, %v555_v37  ;;  %v606_v37 = vmov 1966171168  }
  0xf1   :  { %533 = vmatprep.subr.bf16.mxu0 %v532_v44  ;;  %v479_v38 = vunpack.c.l.s4 %v606_v37 }
  0xf2   :  { %537 = vmatprep.subr.bf16.mxu1 %v536_v45  ;;  %535 = vmatpush1.bf16.msra.mxu0 %v534_v40 }
  0xf3   :  { %539 = vmatpush1.bf16.msra.mxu1 %v538_v42 }
  0xf5   :  { %528 = vmatmul.mubr.msk.f32.vlgmr.msra.gmra.mrb[4].mxu0 %vm254_vm2, %v31_v46 }
  0xf6   :  { %530 = vmatmul.mubr.msk.f32.vlgmr.msra.gmra.mrb[4].mxu1 %vm254_vm2, %v31_v46  ;;  %331 = vmatprep.mubr.f32.mxu0 %v604_v5 }
  0xf7   :  { %408 = vmatprep.mubr.f32.mxu1 %v604_v5 }
  0xf9   :  { %529 = vmatmul.mubr.msk.f32.gmra.mrb[6].mxu0 %vm254_vm2, %v32_v47 }
  0xfa   :  { %531 = vmatmul.mubr.msk.f32.gmra.mrb[6].mxu1 %vm254_vm2, %v32_v47 }
 0x1c8   :  { %v327_v49 = vpop.f32.mrb[4].mxu0 }
 0x1c9   :  { %v328_v50 = vadd.f32 %v327_v49, %v50_v48  ;;  %v404_v51 = vpop.f32.mrb[4].mxu1  ;;  %v329_v52 = vpop.f32.mrb[5].mxu0  ;;  %v467_v49 = vrot.slane %v462_v41, %v466_v36 }
 0x1ca   :  { %v405_v53 = vadd.f32 %v404_v51, %v50_v48  ;;  %v330_v54 = vadd.f32 %v329_v52, %v50_v48  ;;  %v406_v55 = vpop.f32.mrb[5].mxu1 }
 0x1cb   :  { %564 = vtanh.f32 %v328_v50  ;;  %v407_v56 = vadd.f32 %v406_v55, %v50_v48  ;;  %v480_v48 = vunpack.c.0.s8 %v479_v38 }
 0x1cc   :  { %566 = vtanh.f32 %v405_v53  ;;  %v333_v58 = vpop.f32.mrb[6].mxu0 }
 0x1cd   :  { %568 = vtanh.f32 %v330_v54  ;;  %v334_v59 = vadd.f32 %v333_v58, %v55_v57  ;;  %v410_v60 = vpop.f32.mrb[6].mxu1  ;;  %v335_v61 = vpop.f32.mrb[7].mxu0  ;;  %v483_v58 = vsub.s32 %v480_v48, %v465_v27 }
 0x1ce   :  { %570 = vtanh.f32 %v407_v56  ;;  %v411_v62 = vadd.f32 %v410_v60, %v55_v57  ;;  %v336_v63 = vadd.f32 %v335_v61, %v55_v57  ;;  %v412_v0 = vpop.f32.mrb[7].mxu1 }
 0x1cf   :  { %572 = vtanh.f32 %v334_v59  ;;  %v413_v1 = vadd.f32 %v412_v0, %v55_v57 }
 0x1d0   :  { %574 = vtanh.f32 %v411_v62 }
 0x1d1   :  { %576 = vtanh.f32 %v336_v63 }
 0x1d2   :  { %578 = vtanh.f32 %v413_v1 }
 0x1d5   :  { %v565_v2 = vpop.eup %564 }
 0x1d6   :  { %v567_v3 = vpop.eup %566  ;;  %v423_v10 = vmul.f32 %v565_v2, %v62_v7 }
 0x1d7   :  { %v569_v4 = vpop.eup %568  ;;  %v425_v13 = vmul.f32 %v567_v3, %v62_v7 }
 0x1d8   :  { %v571_v5 = vpop.eup %570  ;;  %v424_v17 = vmul.f32 %v569_v4, %v62_v7 }
 0x1d9   :  { %v573_v6 = vpop.eup %572  ;;  %v426_v20 = vmul.f32 %v571_v5, %v62_v7 }
 0x1da   :  { %v575_v9 = vpop.eup %574  ;;  %v427_v11 = vmul.f32 %v573_v6, %v67_v8 }
 0x1db   :  { %v577_v12 = vpop.eup %576  ;;  %v429_v14 = vmul.f32 %v575_v9, %v67_v8 }
 0x1dc   :  { %v579_v15 = vpop.eup %578  ;;  %v428_v18 = vmul.f32 %v577_v12, %v67_v8  ;;  %v431_v19 = vadd.f32 %v427_v11, %v423_v10 }
 0x1dd   :  { %v430_v21 = vmul.f32 %v579_v15, %v67_v8  ;;  %v445_v22 = vadd.f32 %v429_v14, %v425_v13 }
 0x1de   :  { %v432_v23 = vrot.slane %v431_v19, 4  ;;  %v438_v24 = vadd.f32 %v428_v18, %v424_v17 }
 0x1df   :  { %v446_v25 = vrot.slane %v445_v22, 4  ;;  %v452_v26 = vadd.f32 %v430_v21, %v426_v20 }
 0x1e0   :  { %v433_v28 = vadd.f32 %v432_v23, %v431_v19  ;;  %v439_v29 = vrot.slane %v438_v24, 4 }
 0x1e1   :  { %v447_v30 = vadd.f32 %v446_v25, %v445_v22  ;;  %v453_v31 = vrot.slane %v452_v26, 4 }
 0x1e2   :  { %v434_v32 = vrot.slane %v433_v28, 2  ;;  %v440_v33 = vadd.f32 %v439_v29, %v438_v24 }
 0x1e3   :  { %v448_v34 = vrot.slane %v447_v30, 2  ;;  %v454_v35 = vadd.f32 %v453_v31, %v452_v26 }
 0x1e4   :  { %v435_v39 = vadd.f32 %v434_v32, %v433_v28  ;;  %v441_v40 = vrot.slane %v440_v33, 2 }
 0x1e5   :  { %v449_v42 = vadd.f32 %v448_v34, %v447_v30  ;;  %v455_v43 = vrot.slane %v454_v35, 2 }
 0x1e6   :  { %v436_v44 = vrot.slane %v435_v39, 1  ;;  %v442_v45 = vadd.f32 %v441_v40, %v440_v33 }
 0x1e7   :  { %v450_v46 = vrot.slane %v449_v42, 1  ;;  %v456_v47 = vadd.f32 %v455_v43, %v454_v35 }
 0x1e8   :  { %v437_v50 = vadd.f32 %v436_v44, %v435_v39  ;;  %v443_v51 = vrot.slane %v442_v45, 1 }
 0x1e9   :  { %v451_v52 = vadd.f32 %v450_v46, %v449_v42  ;;  %v457_v53 = vrot.slane %v456_v47, 1 }
 0x1ea   :  { %v444_v54 = vadd.f32 %v443_v51, %v442_v45  ;;  %v468_v55 = vadd.f32 %v467_v49, %v437_v50 }
 0x1eb   :  { %v458_v56 = vadd.f32 %v457_v53, %v456_v47  ;;  %v470_v57 = vadd.f32 %v467_v49, %v451_v52 }
 0x1ec   :  { %v469_v59 = vadd.f32 %v467_v49, %v444_v54 }
 0x1ed   :  { %v471_v60 = vadd.f32 %v467_v49, %v458_v56 }
 0x1ee   :  { %v476_v61 = vcombine.low %v468_v55, %v469_v59 }
 0x1ef   :  { %v477_v62 = vcombine.low %v470_v57, %v471_v60 }
 0x1f0   :  { %v484_v63 = vrot.slane %v476_v61, %v483_v58 }
 0x1f1   :  { %v491_v0 = vrot.slane %v477_v62, %v483_v58 }
 0x1f3   :  { %v492_v1 = vcombine.low %v484_v63, %v491_v0 }
 0x1f5   :  { %v499_v2 = vrot.slane %v492_v1, %v483_v58 }
 0x1f7   :  { %505 = vst.msk [vmem:[#allocation3] sm:$0xf] %vm503_vm3, %v499_v2 }
 0x1f8   :  { %510 = vsyncadd [#allocation4], 48  ;;  %s607_s3 = smov [#allocation3]  }
 0x1f9   :  { %s512_s21 = sshll.u32 %s607_s3, 4  ;;  %s513_s21 = int_to_ptr.vmem [resolvable:$true] %s512_s21 }
 0x1fa   :  { %s580_s22 = scalar_lea.vmem %s513_s21, 16  ;;  %s584_s23 = scalar_lea.vmem %s513_s21, 64 }
 0x1fb   :  { %p581_p0 = scmp.ne.s32.totalorder %s513_s21, %s580_s22  ;;  %p585_p1 = scmp.lt.s32.totalorder %s513_s21, %s513_s21 }
 0x1fc   :  { %p586_p2 = scmp.lt.s32.totalorder %s584_s23, %s580_s22 }
 0x1fe   :  { %p587_p3 = por %p586_p2, %p585_p1 }
 0x200   :  { %p588_p4 = pnand %p587_p3, %p581_p0 }
 0x202   :  { %591 = shalt.err (!%p588_p4)
}
 0x203   :  { %s592_s26 = scalar_lea.hbm %s718_s7, 16 }
 0x204   :  { %p593_p5 = scmp.ne.s32.totalorder %s718_s7, %s592_s26  ;;  %p596_p6 = scmp.lt.u32.totalorder %s592_s26, %s718_s7 }
 0x206   :  { %p598_p7 = pnand %p596_p6, %p593_p5 }
 0x208   :  { %601 = shalt.err (!%p598_p7)
}
 0x209   :  { %515 = dma.vmem_to_hbm [thread:$0]  %s513_s21, 16, %s718_s7, [#allocation4]  }
 0x20a   :  { %602 = dma.done.wait [#allocation4], 64  }
 0x20b   :  { %603 = vsyncadd [#allocation4], 4294967232 }
 0x20c   :  { %519 = vsyncpa [#allocation4], 1 }

</bundles_post_ra>
